<compile_context>
chip_gen: v5e
topology: v5e:2x2
jax: 0.10.0
libtpu: 0.0.40
codegen_flags: <defaults>
</compile_context>

<pallas_src>
import functools

import jax
import jax.numpy as jnp
from jax import lax
from jax.experimental import pallas as pl
from jax.experimental.pallas import tpu as pltpu


LANE = 128      # lane width (last-dim tiling granularity)
SUBLANE = 8     # sublane width (second-to-last-dim tiling granularity)


def _round_up(x, m):
    return ((x + m - 1) // m) * m


def _bow_linear_kernel(x_ref, w_ref, b_ref, o_ref, w_pad_ref, *, l8):
    """One (batch-tile i, vocab-tile k) grid step.

    x_ref:     (tm, tv)  bf16  bag-of-words counts tile
    w_ref:     (l8, tv)  bf16  packed weight tile (labels padded only to 8 rows)
    b_ref:     (1,  lp)  f32   bias, lane-padded, VMEM-resident
    o_ref:     (tm, lp)  f32   output block, VMEM-resident across k (accumulator)
    w_pad_ref: (lp, tv)  bf16  scratch: weight zero-padded to a lane-dense operand
    """
    k = pl.program_id(1)

    @pl.when(k == 0)
    def _init():
        o_ref[...] = jnp.zeros_like(o_ref)
        # Zero the padding rows once per batch tile (cheap; rows l8.. stay zero).
        w_pad_ref[...] = jnp.zeros_like(w_pad_ref)

    # Place the real (l8, tv) weight rows into the padded MXU operand.
    w_pad_ref[0:l8, :] = w_ref[...]

    # Contract the shared vocab (last) axis of both operands -> (tm, lp).
    # Accumulation is f32 on the MXU; operands stream in as bf16.
    o_ref[...] += lax.dot_general(
        x_ref[...],
        w_pad_ref[...],
        dimension_numbers=(((1,), (1,)), ((), ())),
        preferred_element_type=jnp.float32,
    )

    @pl.when(k == pl.num_programs(1) - 1)
    def _finalize():
        o_ref[...] += b_ref[...]


@functools.partial(jax.jit, static_argnames=("tm_target", "tv_target"))
def bow_classifier_forward(vec, weight, bias, *, tm_target=512, tv_target=8192):
    """vec: (B, V) f32, weight: (L, V) f32, bias: (L,) f32  ->  (B, L) f32.

    Same math as torch.nn.Linear(vocab_size, num_labels).forward(vec).
    """
    B, V = vec.shape
    L, V2 = weight.shape
    assert V == V2 and bias.shape == (L,)

    l8 = _round_up(max(L, 1), SUBLANE)   # packed weight rows in HBM
    lp = _round_up(max(L, 1), LANE)      # lane-dense output / accumulator width

    # ---- batch tile: multiple of 8; give v7x's second core >= 1 tile ----
    b8 = _round_up(B, SUBLANE)
    tm = min(_round_up(tm_target, SUBLANE), b8)
    if b8 // 2 >= SUBLANE:
        tm = min(tm, _round_up(b8 // 2, SUBLANE))
    bp = _round_up(b8, tm)

    # ---- vocab tile: multiple of 128 ----
    vl = _round_up(V, LANE)
    tv = min(_round_up(tv_target, LANE), vl)
    vp = _round_up(vl, tv)

    # ---- bf16 inputs (f32 accumulation in-kernel); pad only when needed ----
    x_bf = vec.astype(jnp.bfloat16)
    if (bp, vp) != (B, V):
        x_bf = jnp.pad(x_bf, ((0, bp - B), (0, vp - V)))
    w_bf = weight.astype(jnp.bfloat16)
    if (l8, vp) != (L, V):
        w_bf = jnp.pad(w_bf, ((0, l8 - L), (0, vp - V)))
    b_p = jnp.pad(bias.astype(jnp.float32), (0, lp - L)).reshape(1, lp)

    grid = (bp // tm, vp // tv)   # batch axis (parallel) outer, vocab reduction inner

    kernel = functools.partial(_bow_linear_kernel, l8=l8)

    out_p = pl.pallas_call(
        kernel,
        out_shape=jax.ShapeDtypeStruct((bp, lp), jnp.float32),
        grid_spec=pltpu.PrefetchScalarGridSpec(
            num_scalar_prefetch=0,
            grid=grid,
            in_specs=[
                pl.BlockSpec((tm, tv), lambda i, k: (i, k)),   # x tile
                pl.BlockSpec((l8, tv), lambda i, k: (0, k)),   # packed weight tile
                pl.BlockSpec((1, lp), lambda i, k: (0, 0)),    # bias (resident)
            ],
            out_specs=pl.BlockSpec((tm, lp), lambda i, k: (i, 0)),
            scratch_shapes=[pltpu.VMEM((lp, tv), jnp.bfloat16)],
        ),
        compiler_params=pltpu.CompilerParams(
            dimension_semantics=("parallel", "arbitrary"),
            vmem_limit_bytes=40 * 1024 * 1024,   # ~19 MiB working set at default tiles
        ),
    )(x_bf, w_bf, b_p)

    return out_p[:B, :L]


if __name__ == "__main__":
    # Small, BoW-ish shapes: batch=8 "documents", vocab_size=256, num_labels=4.
    B, V, L = 8, 256, 4

    key = jax.random.PRNGKey(0)
    kx, kw, kb = jax.random.split(key, 3)

    # Parameters with the same shapes as nn.Linear(vocab_size, num_labels):
    #   weight: (num_labels, vocab_size), bias: (num_labels,)
    weight = jax.random.normal(kw, (L, V), dtype=jnp.float32) * 0.05
    bias = jax.random.normal(kb, (L,), dtype=jnp.float32) * 0.01

    # Bag-of-words count vectors (non-negative integer counts), shape (B, V).
    vec = jax.random.randint(kx, (B, V), 0, 3).astype(jnp.float32)

    out = bow_classifier_forward(vec, weight, bias)
    out = jax.block_until_ready(out)

    # Reference check (same math as torch nn.Linear forward); tolerance loosened
    # for the bf16 input cast (counts are exact in bf16, weights lose ~8 bits).
    ref = vec @ weight.T + bias
    assert out.shape == (B, L)
    assert jnp.allclose(out, ref, atol=5e-2, rtol=5e-2), float(
        jnp.max(jnp.abs(out - ref))
    )

    print("KERNEL_OK")
</pallas_src>

<mosaic_0001>
module attributes {stable_mosaic.version = 11 : i64} {
  func.func @_bow_linear_kernel(%arg0: i32, %arg1: i32, %arg2: memref<8x256xbf16, #tpu.memory_space<vmem>>, %arg3: memref<8x256xbf16, #tpu.memory_space<vmem>>, %arg4: memref<1x128xf32, #tpu.memory_space<vmem>>, %arg5: memref<8x128xf32, #tpu.memory_space<vmem>>, %arg6: memref<128x256xbf16, #tpu.memory_space<vmem>>) attributes {dimension_semantics = [#tpu.dimension_semantics<parallel>, #tpu.dimension_semantics<arbitrary>], iteration_bounds = array<i64: 1, 1>, scalar_prefetch = 0 : i64, scratch_operands = 1 : i64, tpu.core_type = #tpu.core_type<tc>, window_params = [{transform_indices = @transform_0, window_bounds = array<i64: 8, 256>}, {transform_indices = @transform_1, window_bounds = array<i64: 8, 256>}, {pipeline_mode = #tpu.pipeline_mode<synchronous>, transform_indices = @transform_2, window_bounds = array<i64: 1, 128>}, {transform_indices = @transform_3, window_bounds = array<i64: 8, 128>}]} {
    %c0_i32 = arith.constant 0 : i32
    %0 = arith.cmpi eq, %arg1, %c0_i32 : i32
    %1 = arith.extui %0 : i1 to i32
    %c0_i32_0 = arith.constant 0 : i32
    %2 = arith.cmpi ne, %1, %c0_i32_0 : i32
    scf.if %2 {
      %cst_14 = arith.constant 0.000000e+00 : f32
      %14 = vector.broadcast %cst_14 : f32 to vector<8x128xf32>
      %c0_15 = arith.constant 0 : index
      %c0_16 = arith.constant 0 : index
      %15 = vector.load %arg5[%c0_15, %c0_16] : memref<8x128xf32, #tpu.memory_space<vmem>>, vector<8x128xf32>
      tpu.vector_store %arg5[%c0_15, %c0_16], %14 {strides = array<i32>} : memref<8x128xf32, #tpu.memory_space<vmem>>, vector<8x128xf32>,
      %cst_17 = arith.constant 0.000000e+00 : bf16
      %16 = vector.broadcast %cst_17 : bf16 to vector<128x256xbf16>
      %c0_18 = arith.constant 0 : index
      %c0_19 = arith.constant 0 : index
      %17 = vector.load %arg6[%c0_18, %c0_19] : memref<128x256xbf16, #tpu.memory_space<vmem>>, vector<128x256xbf16>
      tpu.vector_store %arg6[%c0_18, %c0_19], %16 {strides = array<i32>} : memref<128x256xbf16, #tpu.memory_space<vmem>>, vector<128x256xbf16>,
    } else {
    }
    %c0 = arith.constant 0 : index
    %c0_1 = arith.constant 0 : index
    %3 = vector.load %arg3[%c0, %c0_1] : memref<8x256xbf16, #tpu.memory_space<vmem>>, vector<8x256xbf16>
    %c0_2 = arith.constant 0 : index
    %c0_3 = arith.constant 0 : index
    %4 = vector.load %arg6[%c0_2, %c0_3] : memref<128x256xbf16, #tpu.memory_space<vmem>>, vector<8x256xbf16>
    tpu.vector_store %arg6[%c0_2, %c0_3], %3 {strides = array<i32>} : memref<128x256xbf16, #tpu.memory_space<vmem>>, vector<8x256xbf16>,
    %c0_4 = arith.constant 0 : index
    %c0_5 = arith.constant 0 : index
    %5 = vector.load %arg5[%c0_4, %c0_5] : memref<8x128xf32, #tpu.memory_space<vmem>>, vector<8x128xf32>
    %c0_6 = arith.constant 0 : index
    %c0_7 = arith.constant 0 : index
    %6 = vector.load %arg2[%c0_6, %c0_7] : memref<8x256xbf16, #tpu.memory_space<vmem>>, vector<8x256xbf16>
    %c0_8 = arith.constant 0 : index
    %c0_9 = arith.constant 0 : index
    %7 = vector.load %arg6[%c0_8, %c0_9] : memref<128x256xbf16, #tpu.memory_space<vmem>>, vector<128x256xbf16>
    %cst = arith.constant dense<0.000000e+00> : vector<8x128xf32>
    %8 = tpu.matmul %6, %7, %cst {dimension_numbers = #tpu.dot_dimension_numbers<[1], [1], [0], [0], [0, 0, 1, 0], [], []>} : vector<8x256xbf16>, vector<128x256xbf16>, vector<8x128xf32> -> vector<8x128xf32>
    %9 = arith.addf %5, %8 : vector<8x128xf32>
    %c0_10 = arith.constant 0 : index
    %c0_11 = arith.constant 0 : index
    %10 = vector.load %arg5[%c0_10, %c0_11] : memref<8x128xf32, #tpu.memory_space<vmem>>, vector<8x128xf32>
    tpu.vector_store %arg5[%c0_10, %c0_11], %9 {strides = array<i32>} : memref<8x128xf32, #tpu.memory_space<vmem>>, vector<8x128xf32>,
    %c0_i32_12 = arith.constant 0 : i32
    %11 = arith.cmpi eq, %arg1, %c0_i32_12 : i32
    %12 = arith.extui %11 : i1 to i32
    %c0_i32_13 = arith.constant 0 : i32
    %13 = arith.cmpi ne, %12, %c0_i32_13 : i32
    scf.if %13 {
      %c0_14 = arith.constant 0 : index
      %c0_15 = arith.constant 0 : index
      %14 = vector.load %arg5[%c0_14, %c0_15] : memref<8x128xf32, #tpu.memory_space<vmem>>, vector<8x128xf32>
      %c0_16 = arith.constant 0 : index
      %c0_17 = arith.constant 0 : index
      %15 = vector.load %arg4[%c0_16, %c0_17] : memref<1x128xf32, #tpu.memory_space<vmem>>, vector<1x128xf32>
      %16 = vector.broadcast %15 : vector<1x128xf32> to vector<8x128xf32>
      %17 = arith.addf %14, %16 : vector<8x128xf32>
      %c0_18 = arith.constant 0 : index
      %c0_19 = arith.constant 0 : index
      %18 = vector.load %arg5[%c0_18, %c0_19] : memref<8x128xf32, #tpu.memory_space<vmem>>, vector<8x128xf32>
      tpu.vector_store %arg5[%c0_18, %c0_19], %17 {strides = array<i32>} : memref<8x128xf32, #tpu.memory_space<vmem>>, vector<8x128xf32>,
    } else {
    }
    return
  }
  func.func @transform_0(%arg0: i32, %arg1: i32) -> (i32, i32) {
    %c0_i32 = arith.constant 0 : i32
    return %arg0, %arg1 : i32, i32
  }
  func.func @transform_1(%arg0: i32, %arg1: i32) -> (i32, i32) {
    %c0_i32 = arith.constant 0 : i32
    %c0_i32_0 = arith.constant 0 : i32
    return %c0_i32, %arg1 : i32, i32
  }
  func.func @transform_2(%arg0: i32, %arg1: i32) -> (i32, i32) {
    %c0_i32 = arith.constant 0 : i32
    %c0_i32_0 = arith.constant 0 : i32
    %c0_i32_1 = arith.constant 0 : i32
    return %c0_i32, %c0_i32_0 : i32, i32
  }
  func.func @transform_3(%arg0: i32, %arg1: i32) -> (i32, i32) {
    %c0_i32 = arith.constant 0 : i32
    %c0_i32_0 = arith.constant 0 : i32
    return %arg0, %c0_i32 : i32, i32
  }
}

</mosaic_0001>

<bundles_post_ra>
// kernel: bow_classifier_forward.1
= control target key start
LH: loop header
LB: loop body
LE: loop exit
PB: predicated region body
PF: predicated region fallthrough
CT: control target
= control target key end

     0   :  { %v268_v0 = vmov 0   ;;  %s301_s1 = inlined_call_operand.vmem [shape: bf16[8,256], index: 1, kind: input, shape index: {}]   ;;  %s302_s0 = inlined_call_operand.vmem [shape: bf16[8,256], index: 0, kind: input, shape index: {}]   ;;  %s303_s2 = inlined_call_operand.vmem [shape: f32[1,128], index: 2, kind: input, shape index: {}]   ;;  %s304_s3 = inlined_call_operand.vmem [shape: f32[8,128], index: 3, kind: output, shape index: {}]  }
   0x1   :  { %34 = vst [vmem:[#allocation2 + $0x70] sm:$0xff] %v268_v0  ;;  %v36_v19 = vld [vmem:[%s301_s1] sm:$0xff] }
   0x2   :  { %35 = vst [vmem:[#allocation2 + $0x78] sm:$0xff] %v268_v0  ;;  %v39_v50 = vld [vmem:[%s302_s0] sm:$0xff] }
   0x3   :  { %21 = vst [vmem:[#allocation2 + $0x8] sm:$0xff] %v268_v0  ;;  %v57_v51 = vunpack.c.l.b16 %v39_v50  ;;  %v58_v52 = vunpack.c.h.b16 %v39_v50  ;;  %v267_v58 = vld [vmem:[%s303_s2] ss:$0 sm:$0xff] }
   0x4   :  { %22 = vst [vmem:[#allocation2 + $0x10] sm:$0xff] %v268_v0 }
   0x5   :  { %23 = vst [vmem:[#allocation2 + $0x18] sm:$0xff] %v268_v0  ;;  %v59_v53 = vpack.c.b16 %v57_v51, %v57_v51  ;;  %v60_v54 = vpack.c.b16 %v58_v52, %v58_v52 }
   0x6   :  { %24 = vst [vmem:[#allocation2 + $0x20] sm:$0xff] %v268_v0 }
   0x7   :  { %25 = vst [vmem:[#allocation2 + $0x28] sm:$0xff] %v268_v0 }
   0x8   :  { %v243_v1 = vld [vmem:[#allocation2 + $0x70] sm:$0xf]  ;;  %26 = vst [vmem:[#allocation2 + $0x30] sm:$0xff] %v268_v0  ;;  %v263_v2 = vld [vmem:[#allocation2 + $0x74] sm:$0xf] }
   0x9   :  { %v264_v3 = vld [vmem:[#allocation2 + $0x74] sm:$0xf0]  ;;  %27 = vst [vmem:[#allocation2 + $0x38] sm:$0xff] %v268_v0  ;;  %v245_v4 = vld [vmem:[#allocation2 + $0x78] sm:$0xf0] }
   0xa   :  { %v244_v5 = vor.u32 %v264_v3, %v243_v1  ;;  %28 = vst [vmem:[#allocation2 + $0x40] sm:$0xff] %v268_v0  ;;  %v248_v6 = vor.u32 %v263_v2, %v245_v4  ;;  %v250_v44 = vld [vmem:[#allocation2 + $0x4] sm:$0xf0]  ;;  %v189_v47 = vld [vmem:[#allocation2 + $0x8] sm:$0xf0] }
   0xb   :  { %29 = vst [vmem:[#allocation2 + $0x48] sm:$0xff] %v268_v0  ;;  %v195_v38 = vld [vmem:[#allocation2 + $0x10] sm:$0xf]  ;;  %v251_v40 = vld [vmem:[#allocation2 + $0x14] sm:$0xf] }
   0xc   :  { %143 = vmatpush.bf16.xpose.msra.mxu0 %v244_v5  ;;  %30 = vst [vmem:[#allocation2 + $0x50] sm:$0xff] %v268_v0  ;;  %156 = vmatpush.bf16.xpose.msra.mxu1 %v248_v6  ;;  %v252_v39 = vld [vmem:[#allocation2 + $0x14] sm:$0xf0]  ;;  %v197_v41 = vld [vmem:[#allocation2 + $0x18] sm:$0xf0] }
   0xd   :  { %31 = vst [vmem:[#allocation2 + $0x58] sm:$0xff] %v268_v0  ;;  %v203_v32 = vld [vmem:[#allocation2 + $0x20] sm:$0xf]  ;;  %v253_v34 = vld [vmem:[#allocation2 + $0x24] sm:$0xf]  ;;  %v196_v42 = vor.u32 %v252_v39, %v195_v38  ;;  %v200_v43 = vor.u32 %v251_v40, %v197_v41 }
   0xe   :  { %32 = vst [vmem:[#allocation2 + $0x60] sm:$0xff] %v268_v0  ;;  %v254_v33 = vld [vmem:[#allocation2 + $0x24] sm:$0xf0]  ;;  %v205_v35 = vld [vmem:[#allocation2 + $0x28] sm:$0xf0] }
   0xf   :  { %33 = vst [vmem:[#allocation2 + $0x68] sm:$0xff] %v268_v0  ;;  %v211_v26 = vld [vmem:[#allocation2 + $0x30] sm:$0xf]  ;;  %v255_v28 = vld [vmem:[#allocation2 + $0x34] sm:$0xf]  ;;  %v204_v36 = vor.u32 %v254_v33, %v203_v32  ;;  %v208_v37 = vor.u32 %v253_v34, %v205_v35 }
  0x10   :  { %37 = vst [vmem:[#allocation2] sm:$0xff] %v36_v19  ;;  %v256_v27 = vld [vmem:[#allocation2 + $0x34] sm:$0xf0]  ;;  %v213_v29 = vld [vmem:[#allocation2 + $0x38] sm:$0xf0] }
  0x11   :  { %v219_v20 = vld [vmem:[#allocation2 + $0x40] sm:$0xf]  ;;  %v257_v22 = vld [vmem:[#allocation2 + $0x44] sm:$0xf]  ;;  %v212_v30 = vor.u32 %v256_v27, %v211_v26  ;;  %v216_v31 = vor.u32 %v255_v28, %v213_v29 }
  0x12   :  { %v258_v21 = vld [vmem:[#allocation2 + $0x44] sm:$0xf0]  ;;  %v221_v23 = vld [vmem:[#allocation2 + $0x48] sm:$0xf0] }
  0x13   :  { %v227_v13 = vld [vmem:[#allocation2 + $0x50] sm:$0xf]  ;;  %v259_v15 = vld [vmem:[#allocation2 + $0x54] sm:$0xf]  ;;  %v220_v24 = vor.u32 %v258_v21, %v219_v20  ;;  %v224_v25 = vor.u32 %v257_v22, %v221_v23 }
  0x14   :  { %v260_v14 = vld [vmem:[#allocation2 + $0x54] sm:$0xf0]  ;;  %v229_v16 = vld [vmem:[#allocation2 + $0x58] sm:$0xf0] }
  0x15   :  { %v235_v7 = vld [vmem:[#allocation2 + $0x60] sm:$0xf]  ;;  %v261_v8 = vld [vmem:[#allocation2 + $0x64] sm:$0xf]  ;;  %v228_v17 = vor.u32 %v260_v14, %v227_v13  ;;  %v232_v18 = vor.u32 %v259_v15, %v229_v16 }
  0x16   :  { %v262_v9 = vld [vmem:[#allocation2 + $0x64] sm:$0xf0]  ;;  %v237_v10 = vld [vmem:[#allocation2 + $0x68] sm:$0xf0] }
  0x17   :  { %v236_v11 = vor.u32 %v262_v9, %v235_v7  ;;  %v240_v12 = vor.u32 %v261_v8, %v237_v10  ;;  %v187_v45 = vld [vmem:[#allocation2] sm:$0xf]  ;;  %v249_v46 = vld [vmem:[#allocation2 + $0x4] sm:$0xf] }
  0x18   :  { %v188_v48 = vor.u32 %v250_v44, %v187_v45  ;;  %v192_v49 = vor.u32 %v249_v46, %v189_v47 }
  0x19   :  { %144 = vmatpush.bf16.xpose.msra.mxu0 %v236_v11  ;;  %157 = vmatpush.bf16.xpose.msra.mxu1 %v240_v12 }
  0x21   :  { %145 = vmatpush.bf16.xpose.msra.mxu0 %v228_v17  ;;  %158 = vmatpush.bf16.xpose.msra.mxu1 %v232_v18 }
  0x29   :  { %146 = vmatpush.bf16.xpose.msra.mxu0 %v220_v24  ;;  %159 = vmatpush.bf16.xpose.msra.mxu1 %v224_v25 }
  0x31   :  { %147 = vmatpush.bf16.xpose.msra.mxu0 %v212_v30  ;;  %160 = vmatpush.bf16.xpose.msra.mxu1 %v216_v31 }
  0x39   :  { %148 = vmatpush.bf16.xpose.msra.mxu0 %v204_v36  ;;  %161 = vmatpush.bf16.xpose.msra.mxu1 %v208_v37 }
  0x41   :  { %149 = vmatpush.bf16.xpose.msra.mxu0 %v196_v42  ;;  %162 = vmatpush.bf16.xpose.msra.mxu1 %v200_v43 }
  0x49   :  { %150 = vmatpush.bf16.xpose.msra.mxu0 %v188_v48  ;;  %163 = vmatpush.bf16.xpose.msra.mxu1 %v192_v49 }
  0x50   :  { %151 = vmatmul.bf16.vlgmr.msra.gmra.mxu0 %v59_v53  ;;  %164 = vmatmul.bf16.vlgmr.msra.gmra.mxu1 %v60_v54 }
  0xcd   :  { %v152_v55 = vpop.f32.mrf.mxu0  ;;  %v165_v56 = vpop.f32.mrf.mxu1 }
  0xce   :  { %v166_v57 = vadd.f32 %v165_v56, %v152_v55 }
  0xd0   :  { %v179_v59 = vadd.f32 %v267_v58, %v166_v57 }
  0xd2   :  { %180 = vst [vmem:[%s304_s3] sm:$0xff] %v179_v59 }
  0xd5   :  { %v154_v60 = vpop.f32.mrf.mxu0  ;;  %v167_v61 = vpop.f32.mrf.mxu1 }

</bundles_post_ra>
